<compile_context>
chip_gen: v7x
topology: tpu7x:2x2x1
jax: 0.10.0
libtpu: 0.0.40
codegen_flags: <defaults>
</compile_context>

<pallas_src>
import functools

import jax
import jax.numpy as jnp
from jax.experimental import pallas as pl
from jax.experimental.pallas import tpu as pltpu

F_IN = 784   # 28 * 28
HID = 512


def _discriminator_kernel(x_ref, w1_ref, b1_ref, w2_ref, b2_ref, o_ref):
    # fc1: cast the streamed x tile to bf16 in VMEM (no extra HBM pass); w1 is
    # pre-cast bf16 and VMEM-resident across grid steps.  f32 MXU accumulation.
    x = x_ref[...].astype(jnp.bfloat16)
    h = jnp.dot(x, w1_ref[...], preferred_element_type=jnp.float32)
    h = h + b1_ref[...]                                 # (1, 512) f32 bias
    # LeakyReLU(0.1): maximum(h, 0.1*h) == where(h > 0, h, 0.1*h) for slope < 1.
    h = jnp.maximum(h, 0.1 * h)
    # fc2 with N=1: keep it off the MXU -> VPU multiply + XLU lane reduction.
    z = jnp.sum(h * w2_ref[...], axis=-1, keepdims=True)  # (tb, 1)
    z = z + b2_ref[0]                                   # scalar bias from SMEM
    # Sigmoid; the divide rides the EUP slot via the approximate reciprocal.
    o_ref[...] = pl.reciprocal(1.0 + jnp.exp(-z), approx=True)


def prepare_params(w1, b1, w2, b2):
    """Weight prep hoisted out of the forward (do once per optimizer step).

    w1: (784, 512), b1: (512,), w2: (512, 1), b2: (1,)  [x @ W layout, i.e.
    the transpose of torch's weight storage].
    """
    return (
        w1.astype(jnp.bfloat16),                   # MXU operand, resident
        b1.reshape(1, HID).astype(jnp.float32),
        w2.reshape(1, HID).astype(jnp.float32),    # (512, 1) -> (1, 512) row
        b2.reshape(1).astype(jnp.float32),
    )


def _choose_tiling(batch, tile_b):
    rup = lambda v, m: ((v + m - 1) // m) * m
    if batch <= tile_b:
        return max(8, rup(batch, 8)), 1
    # Multi-step: keep an even number of grid steps with balanced tiles so the
    # "parallel" batch axis shards evenly across v7x's 2 TCs (no-op v5e/v6e).
    grid_b = 2 * ((batch + 2 * tile_b - 1) // (2 * tile_b))
    tb = rup((batch + grid_b - 1) // grid_b, 8)
    grid_b = (batch + tb - 1) // tb
    if grid_b > 1 and grid_b % 2 == 1:
        grid_b += 1
    return tb, grid_b


@functools.partial(jax.jit, static_argnames=("tile_b",))
def discriminator_forward(x, params, *, tile_b=2048):
    """x: (B, 1, 28, 28) or (B, 784), float32 or bfloat16 -> (B, 1) float32."""
    w1b, b1r, w2r, b2r = params
    xf = x.reshape(-1, F_IN)           # free view; dtype passed straight through
    B = xf.shape[0]
    tb, grid_b = _choose_tiling(B, tile_b)
    b_pad = grid_b * tb
    if b_pad != B:                     # only materialize a copy when padding
        xf = jnp.pad(xf, ((0, b_pad - B), (0, 0)))

    out = pl.pallas_call(
        _discriminator_kernel,
        out_shape=jax.ShapeDtypeStruct((b_pad, 1), jnp.float32),
        grid=(grid_b,),
        in_specs=[
            # x tile streams (double-buffered); last dim = full 784 is legal.
            pl.BlockSpec((tb, F_IN), lambda i: (i, 0)),
            pl.BlockSpec((F_IN, HID), lambda i: (0, 0)),        # w1 bf16, resident
            pl.BlockSpec((1, HID), lambda i: (0, 0)),           # b1, resident
            pl.BlockSpec((1, HID), lambda i: (0, 0)),           # w2 row, resident
            pl.BlockSpec(memory_space=pltpu.MemorySpace.SMEM),  # b2 scalar
        ],
        out_specs=pl.BlockSpec((tb, 1), lambda i: (i, 0)),
        compiler_params=pltpu.CompilerParams(
            dimension_semantics=("parallel",),
            vmem_limit_bytes=32 * 1024 * 1024,
        ),
    )(xf, w1b, b1r, w2r, b2r)
    return out[:B]


def init_params(key):
    """Deterministic init matching nn.Linear default uniform(-1/sqrt(fan_in), +)."""
    k1, k2, k3, k4 = jax.random.split(key, 4)
    lim1 = 1.0 / jnp.sqrt(784.0)
    lim2 = 1.0 / jnp.sqrt(512.0)
    # Stored as (in, out): kernel does x @ W (equivalent to torch x @ W.T).
    w1 = jax.random.uniform(k1, (784, 512), jnp.float32, -lim1, lim1)
    b1 = jax.random.uniform(k2, (512,), jnp.float32, -lim1, lim1)
    w2 = jax.random.uniform(k3, (512, 1), jnp.float32, -lim2, lim2)
    b2 = jax.random.uniform(k4, (1,), jnp.float32, -lim2, lim2)
    return w1, b1, w2, b2


if __name__ == "__main__":
    key = jax.random.PRNGKey(0)
    kx, kp = jax.random.split(key)
    # Small deterministic batch of MNIST-shaped inputs.
    x = jax.random.normal(kx, (2, 1, 28, 28), jnp.float32)
    w1, b1, w2, b2 = init_params(kp)

    params = prepare_params(w1, b1, w2, b2)     # hoisted weight prep
    out = discriminator_forward(x, params)
    out = jax.block_until_ready(out)
    assert out.shape == (2, 1)

    # Reference with matching bf16 operand rounding (f32 accumulation).
    xf = x.reshape(-1, 784)
    h = jnp.dot(xf.astype(jnp.bfloat16), w1.astype(jnp.bfloat16),
                preferred_element_type=jnp.float32) + b1
    h = jnp.where(h > 0, h, 0.1 * h)
    ref = jax.nn.sigmoid(jnp.sum(h * w2.reshape(1, 512), axis=-1, keepdims=True) + b2)
    assert jnp.allclose(out, ref, atol=5e-3, rtol=5e-3)

    # Sanity vs. full-f32 math (tolerance covers bf16 input rounding).
    h32 = xf @ w1 + b1
    h32 = jnp.where(h32 > 0, h32, 0.1 * h32)
    ref32 = jax.nn.sigmoid(h32 @ w2 + b2)
    assert jnp.allclose(out, ref32, atol=2e-2)

    print("KERNEL_OK")
</pallas_src>

<mosaic_0001>
module attributes {stable_mosaic.version = 11 : i64} {
  func.func @_discriminator_kernel(%arg0: i32, %arg1: memref<8x784xf32, #tpu.memory_space<vmem>>, %arg2: memref<784x512xbf16, #tpu.memory_space<vmem>>, %arg3: memref<1x512xf32, #tpu.memory_space<vmem>>, %arg4: memref<1x512xf32, #tpu.memory_space<vmem>>, %arg5: memref<1xf32, #tpu.memory_space<smem>>, %arg6: memref<8x1xf32, #tpu.memory_space<vmem>>) attributes {dimension_semantics = [#tpu.dimension_semantics<parallel>], iteration_bounds = array<i64: 1>, scalar_prefetch = 0 : i64, scratch_operands = 0 : i64, tpu.core_type = #tpu.core_type<tc>, window_params = [{transform_indices = @transform_0, window_bounds = array<i64: 8, 784>}, {pipeline_mode = #tpu.pipeline_mode<synchronous>, transform_indices = @transform_1, window_bounds = array<i64: 784, 512>}, {pipeline_mode = #tpu.pipeline_mode<synchronous>, transform_indices = @transform_2, window_bounds = array<i64: 1, 512>}, {pipeline_mode = #tpu.pipeline_mode<synchronous>, transform_indices = @transform_3, window_bounds = array<i64: 1, 512>}, {transform_indices = @transform_4, window_bounds = array<i64: 1>}, {transform_indices = @transform_5, window_bounds = array<i64: 8, 1>}]} {
    %c0 = arith.constant 0 : index
    %c0_0 = arith.constant 0 : index
    %0 = vector.load %arg1[%c0, %c0_0] : memref<8x784xf32, #tpu.memory_space<vmem>>, vector<8x784xf32>
    %1 = arith.truncf %0 : vector<8x784xf32> to vector<8x784xbf16>
    %c0_1 = arith.constant 0 : index
    %c0_2 = arith.constant 0 : index
    %2 = vector.load %arg2[%c0_1, %c0_2] : memref<784x512xbf16, #tpu.memory_space<vmem>>, vector<784x512xbf16>
    %cst = arith.constant dense<0.000000e+00> : vector<8x512xf32>
    %3 = tpu.matmul %1, %2, %cst {dimension_numbers = #tpu.dot_dimension_numbers<[1], [0], [0], [1], [0, 0, 1, 1], [], []>} : vector<8x784xbf16>, vector<784x512xbf16>, vector<8x512xf32> -> vector<8x512xf32>
    %c0_3 = arith.constant 0 : index
    %c0_4 = arith.constant 0 : index
    %4 = vector.load %arg3[%c0_3, %c0_4] : memref<1x512xf32, #tpu.memory_space<vmem>>, vector<1x512xf32>
    %5 = vector.broadcast %4 : vector<1x512xf32> to vector<8x512xf32>
    %6 = arith.addf %3, %5 : vector<8x512xf32>
    %cst_5 = arith.constant 1.000000e-01 : f32
    %7 = vector.broadcast %cst_5 : f32 to vector<8x512xf32>
    %8 = arith.mulf %7, %6 : vector<8x512xf32>
    %9 = arith.maximumf %6, %8 : vector<8x512xf32>
    %c0_6 = arith.constant 0 : index
    %c0_7 = arith.constant 0 : index
    %10 = vector.load %arg4[%c0_6, %c0_7] : memref<1x512xf32, #tpu.memory_space<vmem>>, vector<1x512xf32>
    %11 = vector.broadcast %10 : vector<1x512xf32> to vector<8x512xf32>
    %12 = arith.mulf %9, %11 : vector<8x512xf32>
    %cst_8 = arith.constant dense<0.000000e+00> : vector<8xf32>
    %13 = vector.multi_reduction <add>, %12, %cst_8 [1] : vector<8x512xf32> to vector<8xf32>
    %14 = vector.shape_cast %13 : vector<8xf32> to vector<8x1xf32>
    %c0_9 = arith.constant 0 : index
    %15 = memref.load %arg5[%c0_9] : memref<1xf32, #tpu.memory_space<smem>>
    %16 = vector.broadcast %15 : f32 to vector<8x1xf32>
    %17 = arith.addf %14, %16 : vector<8x1xf32>
    %cst_10 = arith.constant 0.000000e+00 : f32
    %18 = vector.broadcast %cst_10 : f32 to vector<8x1xf32>
    %19 = arith.subf %18, %17 : vector<8x1xf32>
    %20 = math.exp %19 : vector<8x1xf32>
    %cst_11 = arith.constant 1.000000e+00 : f32
    %21 = vector.broadcast %cst_11 : f32 to vector<8x1xf32>
    %22 = arith.addf %21, %20 : vector<8x1xf32>
    %23 = tpu.reciprocal %22 {approx = true} : vector<8x1xf32> -> vector<8x1xf32>
    %c0_12 = arith.constant 0 : index
    %c0_13 = arith.constant 0 : index
    %24 = vector.load %arg6[%c0_12, %c0_13] : memref<8x1xf32, #tpu.memory_space<vmem>>, vector<8x1xf32>
    tpu.vector_store %arg6[%c0_12, %c0_13], %23 {strides = array<i32>} : memref<8x1xf32, #tpu.memory_space<vmem>>, vector<8x1xf32>,
    return
  }
  func.func @transform_0(%arg0: i32) -> (i32, i32) {
    %c0_i32 = arith.constant 0 : i32
    %c0_i32_0 = arith.constant 0 : i32
    return %arg0, %c0_i32 : i32, i32
  }
  func.func @transform_1(%arg0: i32) -> (i32, i32) {
    %c0_i32 = arith.constant 0 : i32
    %c0_i32_0 = arith.constant 0 : i32
    %c0_i32_1 = arith.constant 0 : i32
    return %c0_i32, %c0_i32_0 : i32, i32
  }
  func.func @transform_2(%arg0: i32) -> (i32, i32) {
    %c0_i32 = arith.constant 0 : i32
    %c0_i32_0 = arith.constant 0 : i32
    %c0_i32_1 = arith.constant 0 : i32
    return %c0_i32, %c0_i32_0 : i32, i32
  }
  func.func @transform_3(%arg0: i32) -> (i32, i32) {
    %c0_i32 = arith.constant 0 : i32
    %c0_i32_0 = arith.constant 0 : i32
    %c0_i32_1 = arith.constant 0 : i32
    return %c0_i32, %c0_i32_0 : i32, i32
  }
  func.func @transform_4(%arg0: i32) -> i32 {
    %c0_i32 = arith.constant 0 : i32
    %c0_i32_0 = arith.constant 0 : i32
    return %c0_i32 : i32
  }
  func.func @transform_5(%arg0: i32) -> (i32, i32) {
    %c0_i32 = arith.constant 0 : i32
    %c0_i32_0 = arith.constant 0 : i32
    return %arg0, %c0_i32 : i32, i32
  }
}

</mosaic_0001>

<bundles_post_ra>
// kernel: discriminator_forward.1
= control target key start
LH: loop header
LB: loop body
LE: loop exit
PB: predicated region body
PF: predicated region fallthrough
CT: control target
= control target key end

     0   :  { %11 = vsyncpa [#allocation4], 0  ;;  %s2186_s18 = smov [#allocation3]   ;;  %s2265_s0 = inlined_call_operand.vmem [shape: f32[8,784], index: 0, kind: input, shape index: {}]   ;;  %s2266_s1 = inlined_call_operand.hbm [shape: bf16[784,512], index: 1, kind: input, shape index: {}]   ;;  %s2267_s2 = inlined_call_operand.vmem [shape: f32[1,512], index: 2, kind: input, shape index: {}]   ;;  %s2268_s3 = inlined_call_operand.vmem [shape: f32[1,512], index: 3, kind: input, shape index: {}]   ;;  %s2269_s4 = inlined_call_operand.<no memory space> [shape: f32[1], index: 4, kind: input, shape index: {}]   ;;  %s2270_s5 = inlined_call_operand.vmem [shape: f32[8,1], index: 5, kind: output, shape index: {}]  }
   0x1   :  { %s19_s19 = sshll.u32 %s2186_s18, 4  ;;  %s2162_s22 = scalar_lea.hbm %s2266_s1, 25088  ;;  %s20_s19 = int_to_ptr.vmem [resolvable:$true] %s19_s19 }
   0x2   :  { %p2163_p0 = scmp.ne.s32.totalorder %s2266_s1, %s2162_s22  ;;  %p2166_p1 = scmp.lt.u32.totalorder %s2162_s22, %s2266_s1 }
   0x4   :  { %p2168_p2 = pnand %p2166_p1, %p2163_p0 }
   0x6   :  { %2171 = shalt.err (!%p2168_p2)
}
   0x7   :  { %s2172_s27 = scalar_lea.vmem %s20_s19, 25088  ;;  %p2177_p4 = scmp.lt.s32.totalorder %s20_s19, %s20_s19 }
   0x8   :  { %p2173_p3 = scmp.ne.s32.totalorder %s20_s19, %s2172_s27  ;;  %p2178_p5 = scmp.lt.s32.totalorder %s2172_s27, %s2172_s27 }
   0xa   :  { %p2179_p6 = por %p2178_p5, %p2177_p4 }
   0xc   :  { %p2180_p7 = pnand %p2179_p6, %p2173_p3 }
   0xe   :  { %2183 = shalt.err (!%p2180_p7)
}
   0xf   :  { %s2187_s28 = smov 256   ;;  %s2188_s29 = smov 16  }
  0x10   :  { %25 = dma.hbm_to_vmem [thread:$0]  %s2266_s1, 25088, %s20_s19, [#allocation4], %s2187_s28, %s2187_s28, %s2188_s29  }
  0x11   :  { %2184 = dma.done.wait [#allocation4], 25088  }
  0x12   :  { %2185 = vsyncadd [#allocation4], 4294942208  ;;  %v1864_v0 = vld [vmem:[#allocation3 + $0x4] ss:$16 sps:$4 sm:$0xff]   ;;  %v1866_v1 = vld [vmem:[#allocation3 + $0xc] ss:$16 sps:$4 sm:$0xff]  }
  0x13   :  { %1252 = vmatprep.subr.bf16.mxu0 %v1864_v0  ;;  %v1868_v2 = vld [vmem:[#allocation3] ss:$16 sps:$4 sm:$0xff]   ;;  %v1869_v3 = vld [vmem:[#allocation3 + $0x8] ss:$16 sps:$4 sm:$0xff]   ;;  %1416 = vmatprep.subr.bf16.mxu1 %v1866_v1  ;;  %v1870_v4 = vld [vmem:[#allocation3 + $0x24] ss:$16 sps:$4 sm:$0xff]  }
  0x14   :  { %1253 = vmatpush1.bf16.msra.mxu0 %v1868_v2  ;;  %1417 = vmatpush1.bf16.msra.mxu1 %v1869_v3  ;;  %v1872_v5 = vld [vmem:[#allocation3 + $0x2c] ss:$16 sps:$4 sm:$0xff]   ;;  %v1874_v6 = vld [vmem:[#allocation3 + $0x20] ss:$16 sps:$4 sm:$0xff]   ;;  %v1875_v7 = vld [vmem:[#allocation3 + $0x28] ss:$16 sps:$4 sm:$0xff]  }
  0x15   :  { %1254 = vmatprep.subr.bf16.mxu0 %v1870_v4  ;;  %1418 = vmatprep.subr.bf16.mxu1 %v1872_v5  ;;  %v1876_v8 = vld [vmem:[#allocation3 + $0x44] ss:$16 sps:$4 sm:$0xff]   ;;  %v1878_v9 = vld [vmem:[#allocation3 + $0x4c] ss:$16 sps:$4 sm:$0xff]   ;;  %v1880_v10 = vld [vmem:[#allocation3 + $0x40] ss:$16 sps:$4 sm:$0xff]  }
  0x16   :  { %v1881_v11 = vld [vmem:[#allocation3 + $0x48] ss:$16 sps:$4 sm:$0xff]   ;;  %v1882_v12 = vld [vmem:[#allocation3 + $0x64] ss:$16 sps:$4 sm:$0xff]   ;;  %v1884_v13 = vld [vmem:[#allocation3 + $0x6c] ss:$16 sps:$4 sm:$0xff]  }
  0x17   :  { %v1886_v14 = vld [vmem:[#allocation3 + $0x60] ss:$16 sps:$4 sm:$0xff]   ;;  %v1887_v15 = vld [vmem:[#allocation3 + $0x68] ss:$16 sps:$4 sm:$0xff]   ;;  %v1888_v16 = vld [vmem:[#allocation3 + $0x84] ss:$16 sps:$4 sm:$0xff]  }
  0x18   :  { %1255 = vmatpush1.bf16.msra.mxu0 %v1874_v6  ;;  %1419 = vmatpush1.bf16.msra.mxu1 %v1875_v7  ;;  %v1890_v17 = vld [vmem:[#allocation3 + $0x8c] ss:$16 sps:$4 sm:$0xff]   ;;  %v1892_v18 = vld [vmem:[#allocation3 + $0x80] ss:$16 sps:$4 sm:$0xff]   ;;  %v1893_v19 = vld [vmem:[#allocation3 + $0x88] ss:$16 sps:$4 sm:$0xff]  }
  0x19   :  { %1256 = vmatprep.subr.bf16.mxu0 %v1876_v8  ;;  %1420 = vmatprep.subr.bf16.mxu1 %v1878_v9  ;;  %v1894_v20 = vld [vmem:[#allocation3 + $0xa4] ss:$16 sps:$4 sm:$0xff]   ;;  %v1896_v21 = vld [vmem:[#allocation3 + $0xac] ss:$16 sps:$4 sm:$0xff]   ;;  %v1898_v22 = vld [vmem:[#allocation3 + $0xa0] ss:$16 sps:$4 sm:$0xff]  }
  0x1a   :  { %v1899_v23 = vld [vmem:[#allocation3 + $0xa8] ss:$16 sps:$4 sm:$0xff]   ;;  %v1900_v24 = vld [vmem:[#allocation3 + $0xc4] ss:$16 sps:$4 sm:$0xff]   ;;  %v1902_v25 = vld [vmem:[#allocation3 + $0xcc] ss:$16 sps:$4 sm:$0xff]  }
  0x1b   :  { %v1904_v26 = vld [vmem:[#allocation3 + $0xc0] ss:$16 sps:$4 sm:$0xff]   ;;  %v1905_v27 = vld [vmem:[#allocation3 + $0xc8] ss:$16 sps:$4 sm:$0xff]   ;;  %v1906_v28 = vld [vmem:[#allocation3 + $0xe4] ss:$16 sps:$4 sm:$0xff]  }
  0x1c   :  { %1257 = vmatpush1.bf16.msra.mxu0 %v1880_v10  ;;  %1421 = vmatpush1.bf16.msra.mxu1 %v1881_v11  ;;  %v1908_v29 = vld [vmem:[#allocation3 + $0xec] ss:$16 sps:$4 sm:$0xff]   ;;  %v1910_v30 = vld [vmem:[#allocation3 + $0xe0] ss:$16 sps:$4 sm:$0xff]   ;;  %v1911_v31 = vld [vmem:[#allocation3 + $0xe8] ss:$16 sps:$4 sm:$0xff]  }
  0x1d   :  { %1258 = vmatprep.subr.bf16.mxu0 %v1882_v12  ;;  %1422 = vmatprep.subr.bf16.mxu1 %v1884_v13  ;;  %v1912_v32 = vld [vmem:[#allocation3 + $0x104] ss:$16 sps:$4 sm:$0xff]   ;;  %v1914_v33 = vld [vmem:[#allocation3 + $0x10c] ss:$16 sps:$4 sm:$0xff]   ;;  %v1916_v34 = vld [vmem:[#allocation3 + $0x100] ss:$16 sps:$4 sm:$0xff]  }
  0x1e   :  { %v1917_v35 = vld [vmem:[#allocation3 + $0x108] ss:$16 sps:$4 sm:$0xff]   ;;  %v1918_v36 = vld [vmem:[#allocation3 + $0x124] ss:$16 sps:$4 sm:$0xff]   ;;  %v1920_v37 = vld [vmem:[#allocation3 + $0x12c] ss:$16 sps:$4 sm:$0xff]  }
  0x1f   :  { %v1922_v38 = vld [vmem:[#allocation3 + $0x120] ss:$16 sps:$4 sm:$0xff]   ;;  %v1923_v39 = vld [vmem:[#allocation3 + $0x128] ss:$16 sps:$4 sm:$0xff]   ;;  %v1924_v40 = vld [vmem:[#allocation3 + $0x144] ss:$16 sps:$4 sm:$0xff]  }
  0x20   :  { %1259 = vmatpush1.bf16.msra.mxu0 %v1886_v14  ;;  %1423 = vmatpush1.bf16.msra.mxu1 %v1887_v15  ;;  %v1926_v41 = vld [vmem:[#allocation3 + $0x14c] ss:$16 sps:$4 sm:$0xff]   ;;  %v1928_v42 = vld [vmem:[#allocation3 + $0x140] ss:$16 sps:$4 sm:$0xff]   ;;  %v1929_v43 = vld [vmem:[#allocation3 + $0x148] ss:$16 sps:$4 sm:$0xff]  }
  0x21   :  { %1260 = vmatprep.subr.bf16.mxu0 %v1888_v16  ;;  %1424 = vmatprep.subr.bf16.mxu1 %v1890_v17  ;;  %v1930_v44 = vld [vmem:[#allocation3 + $0x164] ss:$16 sps:$4 sm:$0xff]   ;;  %v1932_v45 = vld [vmem:[#allocation3 + $0x16c] ss:$16 sps:$4 sm:$0xff]   ;;  %v1934_v47 = vld [vmem:[#allocation3 + $0x160] ss:$16 sps:$4 sm:$0xff]  }
  0x22   :  { %v37_v46 = vld [vmem:[%s2265_s0 + $0x8] sm:$0xff]  ;;  %v1936_v50 = vld [vmem:[#allocation3 + $0x184] ss:$16 sps:$4 sm:$0xff]   ;;  %v1940_v52 = vld [vmem:[#allocation3 + $0x180] ss:$16 sps:$4 sm:$0xff]   ;;  %vm1248_vm0 = vcmask 130048  }
  0x23   :  { %v44_v48 = vpack.c.bf16 %v37_v46, %v37_v46  ;;  %v1935_v49 = vld [vmem:[#allocation3 + $0x168] ss:$16 sps:$4 sm:$0xff]   ;;  %v1938_v51 = vld [vmem:[#allocation3 + $0x18c] ss:$16 sps:$4 sm:$0xff]   ;;  %v1942_v54 = vld [vmem:[#allocation3 + $0x1a4] ss:$16 sps:$4 sm:$0xff]  }
  0x24   :  { %1261 = vmatpush1.bf16.msra.mxu0 %v1892_v18  ;;  %1425 = vmatpush1.bf16.msra.mxu1 %v1893_v19  ;;  %v1941_v53 = vld [vmem:[#allocation3 + $0x188] ss:$16 sps:$4 sm:$0xff]   ;;  %v1944_v55 = vld [vmem:[#allocation3 + $0x1ac] ss:$16 sps:$4 sm:$0xff]   ;;  %v1946_v56 = vld [vmem:[#allocation3 + $0x1a0] ss:$16 sps:$4 sm:$0xff]  }
  0x25   :  { %1262 = vmatprep.subr.bf16.mxu0 %v1894_v20  ;;  %1426 = vmatprep.subr.bf16.mxu1 %v1896_v21  ;;  %v1947_v57 = vld [vmem:[#allocation3 + $0x1a8] ss:$16 sps:$4 sm:$0xff]   ;;  %v1948_v58 = vld [vmem:[#allocation3 + $0x1c4] ss:$16 sps:$4 sm:$0xff]   ;;  %v1950_v59 = vld [vmem:[#allocation3 + $0x1cc] ss:$16 sps:$4 sm:$0xff]  }
  0x26   :  { %1284 = vmatprep.mubr.bf16.mxu0 %v44_v48  ;;  %1448 = vmatprep.mubr.bf16.mxu1 %v44_v48  ;;  %v1952_v60 = vld [vmem:[#allocation3 + $0x1c0] ss:$16 sps:$4 sm:$0xff]   ;;  %v1953_v61 = vld [vmem:[#allocation3 + $0x1c8] ss:$16 sps:$4 sm:$0xff]   ;;  %v1954_v62 = vld [vmem:[#allocation3 + $0x1e4] ss:$16 sps:$4 sm:$0xff]  }
  0x27   :  { %v1956_v63 = vld [vmem:[#allocation3 + $0x1ec] ss:$16 sps:$4 sm:$0xff]   ;;  %v1958_v0 = vld [vmem:[#allocation3 + $0x1e0] ss:$16 sps:$4 sm:$0xff]   ;;  %v1959_v1 = vld [vmem:[#allocation3 + $0x1e8] ss:$16 sps:$4 sm:$0xff]  }
  0x28   :  { %1263 = vmatpush1.bf16.msra.mxu0 %v1898_v22  ;;  %1427 = vmatpush1.bf16.msra.mxu1 %v1899_v23  ;;  %v36_v2 = vld [vmem:[%s2265_s0] sm:$0xff]  ;;  %v1965_v4 = vld [vmem:[#allocation3 + $0x20c] ss:$16 sps:$4 sm:$0xff]   ;;  %v1963_v7 = vld [vmem:[#allocation3 + $0x208] ss:$16 sps:$4 sm:$0xff]   ;;  %vm1627_vm1 = vcmask 7168  }
  0x29   :  { %1264 = vmatprep.subr.bf16.mxu0 %v1900_v24  ;;  %1428 = vmatprep.subr.bf16.mxu1 %v1902_v25  ;;  %v1962_v3 = vld [vmem:[#allocation3 + $0x204] ss:$16 sps:$4 sm:$0xff]   ;;  %v43_v5 = vpack.c.bf16 %v36_v2, %v36_v2  ;;  %v1960_v6 = vld [vmem:[#allocation3 + $0x200] ss:$16 sps:$4 sm:$0xff]   ;;  %v1971_v9 = vld [vmem:[#allocation3 + $0x22c] ss:$16 sps:$4 sm:$0xff]  }
  0x2a   :  { %v1968_v8 = vld [vmem:[#allocation3 + $0x224] ss:$16 sps:$4 sm:$0xff]   ;;  %v1966_v10 = vld [vmem:[#allocation3 + $0x220] ss:$16 sps:$4 sm:$0xff]   ;;  %v1969_v11 = vld [vmem:[#allocation3 + $0x228] ss:$16 sps:$4 sm:$0xff]  }
  0x2b   :  { %v1974_v12 = vld [vmem:[#allocation3 + $0x244] ss:$16 sps:$4 sm:$0xff]   ;;  %v1977_v13 = vld [vmem:[#allocation3 + $0x24c] ss:$16 sps:$4 sm:$0xff]   ;;  %v1972_v14 = vld [vmem:[#allocation3 + $0x240] ss:$16 sps:$4 sm:$0xff]  }
  0x2c   :  { %1265 = vmatpush1.bf16.msra.mxu0 %v1904_v26  ;;  %1429 = vmatpush1.bf16.msra.mxu1 %v1905_v27  ;;  %v1975_v15 = vld [vmem:[#allocation3 + $0x248] ss:$16 sps:$4 sm:$0xff]   ;;  %v1980_v16 = vld [vmem:[#allocation3 + $0x264] ss:$16 sps:$4 sm:$0xff]   ;;  %v1983_v17 = vld [vmem:[#allocation3 + $0x26c] ss:$16 sps:$4 sm:$0xff]  }
  0x2d   :  { %1266 = vmatprep.subr.bf16.mxu0 %v1906_v28  ;;  %1430 = vmatprep.subr.bf16.mxu1 %v1908_v29  ;;  %v1978_v18 = vld [vmem:[#allocation3 + $0x260] ss:$16 sps:$4 sm:$0xff]   ;;  %v1981_v19 = vld [vmem:[#allocation3 + $0x268] ss:$16 sps:$4 sm:$0xff]   ;;  %v1986_v20 = vld [vmem:[#allocation3 + $0x284] ss:$16 sps:$4 sm:$0xff]  }
  0x2e   :  { %v1989_v21 = vld [vmem:[#allocation3 + $0x28c] ss:$16 sps:$4 sm:$0xff]   ;;  %v1984_v22 = vld [vmem:[#allocation3 + $0x280] ss:$16 sps:$4 sm:$0xff]   ;;  %v1987_v23 = vld [vmem:[#allocation3 + $0x288] ss:$16 sps:$4 sm:$0xff]  }
  0x2f   :  { %v1992_v24 = vld [vmem:[#allocation3 + $0x2a4] ss:$16 sps:$4 sm:$0xff]   ;;  %v1995_v25 = vld [vmem:[#allocation3 + $0x2ac] ss:$16 sps:$4 sm:$0xff]   ;;  %v1990_v26 = vld [vmem:[#allocation3 + $0x2a0] ss:$16 sps:$4 sm:$0xff]  }
  0x30   :  { %1267 = vmatpush1.bf16.msra.mxu0 %v1910_v30  ;;  %1431 = vmatpush1.bf16.msra.mxu1 %v1911_v31  ;;  %v1993_v27 = vld [vmem:[#allocation3 + $0x2a8] ss:$16 sps:$4 sm:$0xff]   ;;  %v1998_v28 = vld [vmem:[#allocation3 + $0x2c4] ss:$16 sps:$4 sm:$0xff]   ;;  %v2001_v29 = vld [vmem:[#allocation3 + $0x2cc] ss:$16 sps:$4 sm:$0xff]  }
  0x31   :  { %1268 = vmatprep.subr.bf16.mxu0 %v1912_v32  ;;  %1432 = vmatprep.subr.bf16.mxu1 %v1914_v33  ;;  %v39_v30 = vld [vmem:[%s2265_s0 + $0x18] sm:$0xff]  ;;  %v1996_v31 = vld [vmem:[#allocation3 + $0x2c0] ss:$16 sps:$4 sm:$0xff]   ;;  %v2022_v46 = vld [vmem:[#allocation3 + $0x344] ss:$16 sps:$4 sm:$0xff]  }
  0x32   :  { %v46_v32 = vpack.c.bf16 %v39_v30, %v39_v30  ;;  %v1999_v33 = vld [vmem:[#allocation3 + $0x2c8] ss:$16 sps:$4 sm:$0xff]   ;;  %v2020_v48 = vld [vmem:[#allocation3 + $0x340] ss:$16 sps:$4 sm:$0xff]   ;;  %v2052_v2 = vld [vmem:[#allocation3 + $0x3e4] ss:$16 sps:$4 sm:$0xff]  }
  0x33   :  { %v2088_v30 = vld [vmem:[#allocation3 + $0x4a4] ss:$16 sps:$4 sm:$0xff]  }
  0x34   :  { %1269 = vmatpush1.bf16.msra.mxu0 %v1916_v34  ;;  %1433 = vmatpush1.bf16.msra.mxu1 %v1917_v35  ;;  %v2004_v34 = vld [vmem:[#allocation3 + $0x2e4] ss:$16 sps:$4 sm:$0xff]   ;;  %v2007_v35 = vld [vmem:[#allocation3 + $0x2ec] ss:$16 sps:$4 sm:$0xff]  }
  0x35   :  { %1270 = vmatprep.subr.bf16.mxu0 %v1918_v36  ;;  %1434 = vmatprep.subr.bf16.mxu1 %v1920_v37  ;;  %v2002_v36 = vld [vmem:[#allocation3 + $0x2e0] ss:$16 sps:$4 sm:$0xff]   ;;  %v2005_v37 = vld [vmem:[#allocation3 + $0x2e8] ss:$16 sps:$4 sm:$0xff]  }
  0x38   :  { %1271 = vmatpush1.bf16.msra.mxu0 %v1922_v38  ;;  %1435 = vmatpush1.bf16.msra.mxu1 %v1923_v39  ;;  %v2010_v38 = vld [vmem:[#allocation3 + $0x304] ss:$16 sps:$4 sm:$0xff]   ;;  %v2013_v39 = vld [vmem:[#allocation3 + $0x30c] ss:$16 sps:$4 sm:$0xff]  }
  0x39   :  { %1272 = vmatprep.subr.bf16.mxu0 %v1924_v40  ;;  %1436 = vmatprep.subr.bf16.mxu1 %v1926_v41  ;;  %v2008_v40 = vld [vmem:[#allocation3 + $0x300] ss:$16 sps:$4 sm:$0xff]   ;;  %v2011_v41 = vld [vmem:[#allocation3 + $0x308] ss:$16 sps:$4 sm:$0xff]  }
  0x3c   :  { %1273 = vmatpush1.bf16.msra.mxu0 %v1928_v42  ;;  %1437 = vmatpush1.bf16.msra.mxu1 %v1929_v43  ;;  %v2016_v42 = vld [vmem:[#allocation3 + $0x324] ss:$16 sps:$4 sm:$0xff]   ;;  %v2019_v43 = vld [vmem:[#allocation3 + $0x32c] ss:$16 sps:$4 sm:$0xff]  }
  0x3d   :  { %1274 = vmatprep.subr.bf16.mxu0 %v1930_v44  ;;  %1438 = vmatprep.subr.bf16.mxu1 %v1932_v45  ;;  %v2014_v44 = vld [vmem:[#allocation3 + $0x320] ss:$16 sps:$4 sm:$0xff]   ;;  %v2017_v45 = vld [vmem:[#allocation3 + $0x328] ss:$16 sps:$4 sm:$0xff]  }
  0x40   :  { %1275 = vmatpush1.bf16.msra.mxu0 %v1934_v47  ;;  %1439 = vmatpush1.bf16.msra.mxu1 %v1935_v49  ;;  %v2025_v47 = vld [vmem:[#allocation3 + $0x34c] ss:$16 sps:$4 sm:$0xff]   ;;  %v2023_v49 = vld [vmem:[#allocation3 + $0x348] ss:$16 sps:$4 sm:$0xff]  }
  0x41   :  { %1276 = vmatprep.subr.bf16.mxu0 %v1936_v50  ;;  %1440 = vmatprep.subr.bf16.mxu1 %v1938_v51  ;;  %v2028_v50 = vld [vmem:[#allocation3 + $0x364] ss:$16 sps:$4 sm:$0xff]   ;;  %v2031_v51 = vld [vmem:[#allocation3 + $0x36c] ss:$16 sps:$4 sm:$0xff]  }
  0x44   :  { %1277 = vmatpush1.bf16.msra.mxu0 %v1940_v52  ;;  %1441 = vmatpush1.bf16.msra.mxu1 %v1941_v53  ;;  %v2026_v52 = vld [vmem:[#allocation3 + $0x360] ss:$16 sps:$4 sm:$0xff]   ;;  %v2029_v53 = vld [vmem:[#allocation3 + $0x368] ss:$16 sps:$4 sm:$0xff]  }
  0x45   :  { %1278 = vmatprep.subr.bf16.mxu0 %v1942_v54  ;;  %1442 = vmatprep.subr.bf16.mxu1 %v1944_v55  ;;  %v2034_v54 = vld [vmem:[#allocation3 + $0x384] ss:$16 sps:$4 sm:$0xff]   ;;  %v2037_v55 = vld [vmem:[#allocation3 + $0x38c] ss:$16 sps:$4 sm:$0xff]  }
  0x48   :  { %1279 = vmatpush1.bf16.msra.mxu0 %v1946_v56  ;;  %1443 = vmatpush1.bf16.msra.mxu1 %v1947_v57  ;;  %v2032_v56 = vld [vmem:[#allocation3 + $0x380] ss:$16 sps:$4 sm:$0xff]   ;;  %v2035_v57 = vld [vmem:[#allocation3 + $0x388] ss:$16 sps:$4 sm:$0xff]  }
  0x49   :  { %1280 = vmatprep.subr.bf16.mxu0 %v1948_v58  ;;  %1444 = vmatprep.subr.bf16.mxu1 %v1950_v59  ;;  %v2040_v58 = vld [vmem:[#allocation3 + $0x3a4] ss:$16 sps:$4 sm:$0xff]   ;;  %v2043_v59 = vld [vmem:[#allocation3 + $0x3ac] ss:$16 sps:$4 sm:$0xff]  }
  0x4c   :  { %1281 = vmatpush1.bf16.msra.mxu0 %v1952_v60  ;;  %1445 = vmatpush1.bf16.msra.mxu1 %v1953_v61  ;;  %v2038_v60 = vld [vmem:[#allocation3 + $0x3a0] ss:$16 sps:$4 sm:$0xff]   ;;  %v2041_v61 = vld [vmem:[#allocation3 + $0x3a8] ss:$16 sps:$4 sm:$0xff]  }
  0x4d   :  { %1282 = vmatprep.subr.bf16.mxu0 %v1954_v62  ;;  %1446 = vmatprep.subr.bf16.mxu1 %v1956_v63  ;;  %v2046_v62 = vld [vmem:[#allocation3 + $0x3c4] ss:$16 sps:$4 sm:$0xff]   ;;  %v2049_v63 = vld [vmem:[#allocation3 + $0x3cc] ss:$16 sps:$4 sm:$0xff]  }
  0x50   :  { %1283 = vmatpush1.bf16.msra.mxu0 %v1958_v0  ;;  %1447 = vmatpush1.bf16.msra.mxu1 %v1959_v1  ;;  %v2044_v0 = vld [vmem:[#allocation3 + $0x3c0] ss:$16 sps:$4 sm:$0xff]   ;;  %v2047_v1 = vld [vmem:[#allocation3 + $0x3c8] ss:$16 sps:$4 sm:$0xff]  }
  0x51   :  { %1293 = vmatprep.subr.bf16.mxu0 %v1962_v3  ;;  %1457 = vmatprep.subr.bf16.mxu1 %v1965_v4  ;;  %v2055_v3 = vld [vmem:[#allocation3 + $0x3ec] ss:$16 sps:$4 sm:$0xff]   ;;  %v2050_v4 = vld [vmem:[#allocation3 + $0x3e0] ss:$16 sps:$4 sm:$0xff]  }
  0x53   :  { %1285 = vmatmul.mubr.bf16.vlgmr.msra.gmra.mrb[0].mxu0 %v43_v5  ;;  %1449 = vmatmul.mubr.bf16.vlgmr.msra.gmra.mrb[0].mxu1 %v43_v5  ;;  %v2053_v5 = vld [vmem:[#allocation3 + $0x3e8] ss:$16 sps:$4 sm:$0xff]  }
  0x54   :  { %1294 = vmatpush1.bf16.msra.mxu0 %v1960_v6  ;;  %1458 = vmatpush1.bf16.msra.mxu1 %v1963_v7  ;;  %v2058_v6 = vld [vmem:[#allocation3 + $0x404] ss:$16 sps:$4 sm:$0xff]  }
  0x55   :  { %1295 = vmatprep.subr.bf16.mxu0 %v1968_v8  ;;  %1459 = vmatprep.subr.bf16.mxu1 %v1971_v9  ;;  %v38_v7 = vld [vmem:[%s2265_s0 + $0x10] sm:$0xff]  ;;  %v2061_v8 = vld [vmem:[#allocation3 + $0x40c] ss:$16 sps:$4 sm:$0xff]  }
  0x56   :  { %1325 = vmatprep.mubr.bf16.mxu0 %v46_v32  ;;  %1489 = vmatprep.mubr.bf16.mxu1 %v46_v32  ;;  %v2056_v9 = vld [vmem:[#allocation3 + $0x400] ss:$16 sps:$4 sm:$0xff]  }
  0x57   :  { %v2086_v32 = vld [vmem:[#allocation3 + $0x4a0] ss:$16 sps:$4 sm:$0xff]  }
  0x58   :  { %1296 = vmatpush1.bf16.msra.mxu0 %v1966_v10  ;;  %1460 = vmatpush1.bf16.msra.mxu1 %v1969_v11  ;;  %v45_v10 = vpack.c.bf16 %v38_v7, %v38_v7  ;;  %v2059_v11 = vld [vmem:[#allocation3 + $0x408] ss:$16 sps:$4 sm:$0xff]   ;;  %v2151_v7 = vld [vmem:[#allocation3 + $0x5ec] ss:$16 sps:$4 sm:$0xff]  }
  0x59   :  { %1297 = vmatprep.subr.bf16.mxu0 %v1974_v12  ;;  %1461 = vmatprep.subr.bf16.mxu1 %v1977_v13  ;;  %v2064_v12 = vld [vmem:[#allocation3 + $0x424] ss:$16 sps:$4 sm:$0xff]   ;;  %v2067_v13 = vld [vmem:[#allocation3 + $0x42c] ss:$16 sps:$4 sm:$0xff]  }
  0x5c   :  { %1298 = vmatpush1.bf16.msra.mxu0 %v1972_v14  ;;  %1462 = vmatpush1.bf16.msra.mxu1 %v1975_v15  ;;  %v41_v14 = vld [vmem:[%s2265_s0 + $0x28] sm:$0xff] }
  0x5d   :  { %1299 = vmatprep.subr.bf16.mxu0 %v1980_v16  ;;  %1463 = vmatprep.subr.bf16.mxu1 %v1983_v17  ;;  %v48_v15 = vpack.c.bf16 %v41_v14, %v41_v14  ;;  %v2062_v16 = vld [vmem:[#allocation3 + $0x420] ss:$16 sps:$4 sm:$0xff]   ;;  %v2065_v17 = vld [vmem:[#allocation3 + $0x428] ss:$16 sps:$4 sm:$0xff]  }
  0x5e   :  { %v2152_v14 = vld [vmem:[#allocation3 + $0x600] ss:$16 sps:$4 sm:$0xff]  }
  0x60   :  { %1300 = vmatpush1.bf16.msra.mxu0 %v1978_v18  ;;  %1464 = vmatpush1.bf16.msra.mxu1 %v1981_v19  ;;  %v2070_v18 = vld [vmem:[#allocation3 + $0x444] ss:$16 sps:$4 sm:$0xff]   ;;  %v2073_v19 = vld [vmem:[#allocation3 + $0x44c] ss:$16 sps:$4 sm:$0xff]  }
  0x61   :  { %1301 = vmatprep.subr.bf16.mxu0 %v1986_v20  ;;  %1465 = vmatprep.subr.bf16.mxu1 %v1989_v21  ;;  %v2068_v20 = vld [vmem:[#allocation3 + $0x440] ss:$16 sps:$4 sm:$0xff]   ;;  %v2071_v21 = vld [vmem:[#allocation3 + $0x448] ss:$16 sps:$4 sm:$0xff]  }
  0x64   :  { %1302 = vmatpush1.bf16.msra.mxu0 %v1984_v22  ;;  %1466 = vmatpush1.bf16.msra.mxu1 %v1987_v23  ;;  %v2076_v22 = vld [vmem:[#allocation3 + $0x464] ss:$16 sps:$4 sm:$0xff]   ;;  %v2079_v23 = vld [vmem:[#allocation3 + $0x46c] ss:$16 sps:$4 sm:$0xff]  }
  0x65   :  { %1303 = vmatprep.subr.bf16.mxu0 %v1992_v24  ;;  %1467 = vmatprep.subr.bf16.mxu1 %v1995_v25  ;;  %v2074_v24 = vld [vmem:[#allocation3 + $0x460] ss:$16 sps:$4 sm:$0xff]   ;;  %v2077_v25 = vld [vmem:[#allocation3 + $0x468] ss:$16 sps:$4 sm:$0xff]  }
  0x68   :  { %1304 = vmatpush1.bf16.msra.mxu0 %v1990_v26  ;;  %1468 = vmatpush1.bf16.msra.mxu1 %v1993_v27  ;;  %v2082_v26 = vld [vmem:[#allocation3 + $0x484] ss:$16 sps:$4 sm:$0xff]   ;;  %v2085_v27 = vld [vmem:[#allocation3 + $0x48c] ss:$16 sps:$4 sm:$0xff]  }
  0x69   :  { %1305 = vmatprep.subr.bf16.mxu0 %v1998_v28  ;;  %1469 = vmatprep.subr.bf16.mxu1 %v2001_v29  ;;  %v2080_v28 = vld [vmem:[#allocation3 + $0x480] ss:$16 sps:$4 sm:$0xff]   ;;  %v2083_v29 = vld [vmem:[#allocation3 + $0x488] ss:$16 sps:$4 sm:$0xff]  }
  0x6c   :  { %1306 = vmatpush1.bf16.msra.mxu0 %v1996_v31  ;;  %1470 = vmatpush1.bf16.msra.mxu1 %v1999_v33  ;;  %v2091_v31 = vld [vmem:[#allocation3 + $0x4ac] ss:$16 sps:$4 sm:$0xff]   ;;  %v2089_v33 = vld [vmem:[#allocation3 + $0x4a8] ss:$16 sps:$4 sm:$0xff]  }
  0x6d   :  { %1307 = vmatprep.subr.bf16.mxu0 %v2004_v34  ;;  %1471 = vmatprep.subr.bf16.mxu1 %v2007_v35  ;;  %v2094_v34 = vld [vmem:[#allocation3 + $0x4c4] ss:$16 sps:$4 sm:$0xff]   ;;  %v2097_v35 = vld [vmem:[#allocation3 + $0x4cc] ss:$16 sps:$4 sm:$0xff]  }
  0x70   :  { %1308 = vmatpush1.bf16.msra.mxu0 %v2002_v36  ;;  %1472 = vmatpush1.bf16.msra.mxu1 %v2005_v37  ;;  %v2092_v36 = vld [vmem:[#allocation3 + $0x4c0] ss:$16 sps:$4 sm:$0xff]   ;;  %v2095_v37 = vld [vmem:[#allocation3 + $0x4c8] ss:$16 sps:$4 sm:$0xff]  }
  0x71   :  { %1309 = vmatprep.subr.bf16.mxu0 %v2010_v38  ;;  %1473 = vmatprep.subr.bf16.mxu1 %v2013_v39  ;;  %v2100_v38 = vld [vmem:[#allocation3 + $0x4e4] ss:$16 sps:$4 sm:$0xff]   ;;  %v2103_v39 = vld [vmem:[#allocation3 + $0x4ec] ss:$16 sps:$4 sm:$0xff]  }
  0x74   :  { %1310 = vmatpush1.bf16.msra.mxu0 %v2008_v40  ;;  %1474 = vmatpush1.bf16.msra.mxu1 %v2011_v41  ;;  %v2098_v40 = vld [vmem:[#allocation3 + $0x4e0] ss:$16 sps:$4 sm:$0xff]   ;;  %v2101_v41 = vld [vmem:[#allocation3 + $0x4e8] ss:$16 sps:$4 sm:$0xff]  }
  0x75   :  { %1311 = vmatprep.subr.bf16.mxu0 %v2016_v42  ;;  %1475 = vmatprep.subr.bf16.mxu1 %v2019_v43  ;;  %v2106_v42 = vld [vmem:[#allocation3 + $0x504] ss:$16 sps:$4 sm:$0xff]   ;;  %v2109_v43 = vld [vmem:[#allocation3 + $0x50c] ss:$16 sps:$4 sm:$0xff]  }
  0x78   :  { %1312 = vmatpush1.bf16.msra.mxu0 %v2014_v44  ;;  %1476 = vmatpush1.bf16.msra.mxu1 %v2017_v45  ;;  %v2104_v44 = vld [vmem:[#allocation3 + $0x500] ss:$16 sps:$4 sm:$0xff]   ;;  %v2107_v45 = vld [vmem:[#allocation3 + $0x508] ss:$16 sps:$4 sm:$0xff]  }
  0x79   :  { %1313 = vmatprep.subr.bf16.mxu0 %v2022_v46  ;;  %1477 = vmatprep.subr.bf16.mxu1 %v2025_v47  ;;  %v2112_v46 = vld [vmem:[#allocation3 + $0x524] ss:$16 sps:$4 sm:$0xff]   ;;  %v2115_v47 = vld [vmem:[#allocation3 + $0x52c] ss:$16 sps:$4 sm:$0xff]  }
  0x7c   :  { %1314 = vmatpush1.bf16.msra.mxu0 %v2020_v48  ;;  %1478 = vmatpush1.bf16.msra.mxu1 %v2023_v49  ;;  %v2110_v48 = vld [vmem:[#allocation3 + $0x520] ss:$16 sps:$4 sm:$0xff]   ;;  %v2113_v49 = vld [vmem:[#allocation3 + $0x528] ss:$16 sps:$4 sm:$0xff]  }
  0x7d   :  { %1315 = vmatprep.subr.bf16.mxu0 %v2028_v50  ;;  %1479 = vmatprep.subr.bf16.mxu1 %v2031_v51  ;;  %v2118_v50 = vld [vmem:[#allocation3 + $0x544] ss:$16 sps:$4 sm:$0xff]   ;;  %v2121_v51 = vld [vmem:[#allocation3 + $0x54c] ss:$16 sps:$4 sm:$0xff]  }
  0x80   :  { %1316 = vmatpush1.bf16.msra.mxu0 %v2026_v52  ;;  %1480 = vmatpush1.bf16.msra.mxu1 %v2029_v53  ;;  %v2116_v52 = vld [vmem:[#allocation3 + $0x540] ss:$16 sps:$4 sm:$0xff]   ;;  %v2119_v53 = vld [vmem:[#allocation3 + $0x548] ss:$16 sps:$4 sm:$0xff]  }
  0x81   :  { %1317 = vmatprep.subr.bf16.mxu0 %v2034_v54  ;;  %1481 = vmatprep.subr.bf16.mxu1 %v2037_v55  ;;  %v2124_v54 = vld [vmem:[#allocation3 + $0x564] ss:$16 sps:$4 sm:$0xff]   ;;  %v2127_v55 = vld [vmem:[#allocation3 + $0x56c] ss:$16 sps:$4 sm:$0xff]  }
  0x84   :  { %1318 = vmatpush1.bf16.msra.mxu0 %v2032_v56  ;;  %1482 = vmatpush1.bf16.msra.mxu1 %v2035_v57  ;;  %v2122_v56 = vld [vmem:[#allocation3 + $0x560] ss:$16 sps:$4 sm:$0xff]   ;;  %v2125_v57 = vld [vmem:[#allocation3 + $0x568] ss:$16 sps:$4 sm:$0xff]  }
  0x85   :  { %1319 = vmatprep.subr.bf16.mxu0 %v2040_v58  ;;  %1483 = vmatprep.subr.bf16.mxu1 %v2043_v59  ;;  %v2130_v58 = vld [vmem:[#allocation3 + $0x584] ss:$16 sps:$4 sm:$0xff]   ;;  %v2133_v59 = vld [vmem:[#allocation3 + $0x58c] ss:$16 sps:$4 sm:$0xff]  }
  0x88   :  { %1320 = vmatpush1.bf16.msra.mxu0 %v2038_v60  ;;  %1484 = vmatpush1.bf16.msra.mxu1 %v2041_v61  ;;  %v2128_v60 = vld [vmem:[#allocation3 + $0x580] ss:$16 sps:$4 sm:$0xff]   ;;  %v2131_v61 = vld [vmem:[#allocation3 + $0x588] ss:$16 sps:$4 sm:$0xff]  }
  0x89   :  { %1321 = vmatprep.subr.bf16.mxu0 %v2046_v62  ;;  %1485 = vmatprep.subr.bf16.mxu1 %v2049_v63  ;;  %v2136_v62 = vld [vmem:[#allocation3 + $0x5a4] ss:$16 sps:$4 sm:$0xff]   ;;  %v2139_v63 = vld [vmem:[#allocation3 + $0x5ac] ss:$16 sps:$4 sm:$0xff]  }
  0x8c   :  { %1322 = vmatpush1.bf16.msra.mxu0 %v2044_v0  ;;  %1486 = vmatpush1.bf16.msra.mxu1 %v2047_v1  ;;  %v2134_v0 = vld [vmem:[#allocation3 + $0x5a0] ss:$16 sps:$4 sm:$0xff]   ;;  %v2137_v1 = vld [vmem:[#allocation3 + $0x5a8] ss:$16 sps:$4 sm:$0xff]  }
  0x8d   :  { %1323 = vmatprep.subr.bf16.mxu0 %v2052_v2  ;;  %1487 = vmatprep.subr.bf16.mxu1 %v2055_v3  ;;  %v2142_v2 = vld [vmem:[#allocation3 + $0x5c4] ss:$16 sps:$4 sm:$0xff]   ;;  %v2145_v3 = vld [vmem:[#allocation3 + $0x5cc] ss:$16 sps:$4 sm:$0xff]  }
  0x90   :  { %1324 = vmatpush1.bf16.msra.mxu0 %v2050_v4  ;;  %1488 = vmatpush1.bf16.msra.mxu1 %v2053_v5  ;;  %v2140_v4 = vld [vmem:[#allocation3 + $0x5c0] ss:$16 sps:$4 sm:$0xff]   ;;  %v2143_v5 = vld [vmem:[#allocation3 + $0x5c8] ss:$16 sps:$4 sm:$0xff]  }
  0x91   :  { %1334 = vmatprep.subr.bf16.mxu0 %v2058_v6  ;;  %1498 = vmatprep.subr.bf16.mxu1 %v2061_v8  ;;  %v2148_v6 = vld [vmem:[#allocation3 + $0x5e4] ss:$16 sps:$4 sm:$0xff]   ;;  %v2146_v8 = vld [vmem:[#allocation3 + $0x5e0] ss:$16 sps:$4 sm:$0xff]  }
  0x93   :  { %1326 = vmatmul.mubr.bf16.vlgmr.msra.gmra.mrb[0].mxu0 %v45_v10  ;;  %1490 = vmatmul.mubr.bf16.vlgmr.msra.gmra.mrb[0].mxu1 %v45_v10  ;;  %v40_v10 = vld [vmem:[%s2265_s0 + $0x20] sm:$0xff] }
  0x94   :  { %1335 = vmatpush1.bf16.msra.mxu0 %v2056_v9  ;;  %1499 = vmatpush1.bf16.msra.mxu1 %v2059_v11  ;;  %v2149_v9 = vld [vmem:[#allocation3 + $0x5e8] ss:$16 sps:$4 sm:$0xff]   ;;  %v2154_v11 = vld [vmem:[#allocation3 + $0x604] ss:$16 sps:$4 sm:$0xff]  }
  0x95   :  { %1336 = vmatprep.subr.bf16.mxu0 %v2064_v12  ;;  %1500 = vmatprep.subr.bf16.mxu1 %v2067_v13  ;;  %v2157_v12 = vld [vmem:[#allocation3 + $0x60c] ss:$16 sps:$4 sm:$0xff]   ;;  %v47_v13 = vpack.c.bf16 %v40_v10, %v40_v10 }
  0x96   :  { %1366 = vmatprep.mubr.bf16.mxu0 %v48_v15  ;;  %1530 = vmatprep.mubr.bf16.mxu1 %v48_v15  ;;  %v2155_v15 = vld [vmem:[#allocation3 + $0x608] ss:$16 sps:$4 sm:$0xff]  }
  0x98   :  { %1337 = vmatpush1.bf16.msra.mxu0 %v2062_v16  ;;  %1501 = vmatpush1.bf16.msra.mxu1 %v2065_v17  ;;  %v2189_v16 = vmov 0   ;;  %v42_v17 = vld [vmem:[%s2265_s0 + $0x30] sm:$0xff] }
  0x99   :  { %1338 = vmatprep.subr.bf16.mxu0 %v2070_v18  ;;  %1502 = vmatprep.subr.bf16.mxu1 %v2073_v19  ;;  %v49_v18 = vpack.c.bf16 %v42_v17, %v42_v17  ;;  %v248_v19 = vlaneseq }
  0x9c   :  { %1339 = vmatpush1.bf16.msra.mxu0 %v2068_v20  ;;  %1503 = vmatpush1.bf16.msra.mxu1 %v2071_v21  ;;  %v249_v20 = vshrl.u32 %v248_v19, 7 }
  0x9d   :  { %1340 = vmatprep.subr.bf16.mxu0 %v2076_v22  ;;  %1504 = vmatprep.subr.bf16.mxu1 %v2079_v23  ;;  %v246_v23 = vld [vmem:[%s2267_s2] sm:$0xf] }
  0x9e   :  { %v250_v21 = vsub.s32 0, %v249_v20  ;;  %v258_v22 = vsub.s32 2, %v249_v20 }
  0xa0   :  { %1341 = vmatpush1.bf16.msra.mxu0 %v2074_v24  ;;  %1505 = vmatpush1.bf16.msra.mxu1 %v2077_v25  ;;  %v254_v24 = vsub.s32 1, %v249_v20  ;;  %v262_v25 = vsub.s32 3, %v249_v20 }
  0xa1   :  { %1342 = vmatprep.subr.bf16.mxu0 %v2082_v26  ;;  %1506 = vmatprep.subr.bf16.mxu1 %v2085_v27  ;;  %v251_v26 = vrot.slane %v246_v23, %v250_v21  ;;  %v259_v27 = vrot.slane %v246_v23, %v258_v22 }
  0xa4   :  { %1343 = vmatpush1.bf16.msra.mxu0 %v2080_v28  ;;  %1507 = vmatpush1.bf16.msra.mxu1 %v2083_v29  ;;  %v255_v28 = vrot.slane %v246_v23, %v254_v24  ;;  %v263_v29 = vrot.slane %v246_v23, %v262_v25 }
  0xa5   :  { %1344 = vmatprep.subr.bf16.mxu0 %v2088_v30  ;;  %1508 = vmatprep.subr.bf16.mxu1 %v2091_v31  ;;  %v1588_v31 = vld [vmem:[%s2268_s3] sm:$0xf] }
  0xa8   :  { %1345 = vmatpush1.bf16.msra.mxu0 %v2086_v32  ;;  %1509 = vmatpush1.bf16.msra.mxu1 %v2089_v33 }
  0xa9   :  { %1346 = vmatprep.subr.bf16.mxu0 %v2094_v34  ;;  %1510 = vmatprep.subr.bf16.mxu1 %v2097_v35 }
  0xac   :  { %1347 = vmatpush1.bf16.msra.mxu0 %v2092_v36  ;;  %1511 = vmatpush1.bf16.msra.mxu1 %v2095_v37 }
  0xad   :  { %1348 = vmatprep.subr.bf16.mxu0 %v2100_v38  ;;  %1512 = vmatprep.subr.bf16.mxu1 %v2103_v39 }
  0xb0   :  { %1349 = vmatpush1.bf16.msra.mxu0 %v2098_v40  ;;  %1513 = vmatpush1.bf16.msra.mxu1 %v2101_v41 }
  0xb1   :  { %1350 = vmatprep.subr.bf16.mxu0 %v2106_v42  ;;  %1514 = vmatprep.subr.bf16.mxu1 %v2109_v43  ;;  %v1593_v42 = vrot.slane %v1588_v31, %v250_v21 }
  0xb4   :  { %1351 = vmatpush1.bf16.msra.mxu0 %v2104_v44  ;;  %1515 = vmatpush1.bf16.msra.mxu1 %v2107_v45 }
  0xb5   :  { %1352 = vmatprep.subr.bf16.mxu0 %v2112_v46  ;;  %1516 = vmatprep.subr.bf16.mxu1 %v2115_v47  ;;  %v1597_v47 = vrot.slane %v1588_v31, %v254_v24 }
  0xb8   :  { %1353 = vmatpush1.bf16.msra.mxu0 %v2110_v48  ;;  %1517 = vmatpush1.bf16.msra.mxu1 %v2113_v49 }
  0xb9   :  { %1354 = vmatprep.subr.bf16.mxu0 %v2118_v50  ;;  %1518 = vmatprep.subr.bf16.mxu1 %v2121_v51 }
  0xbc   :  { %1355 = vmatpush1.bf16.msra.mxu0 %v2116_v52  ;;  %1519 = vmatpush1.bf16.msra.mxu1 %v2119_v53  ;;  %v1601_v52 = vrot.slane %v1588_v31, %v258_v22 }
  0xbd   :  { %1356 = vmatprep.subr.bf16.mxu0 %v2124_v54  ;;  %1520 = vmatprep.subr.bf16.mxu1 %v2127_v55 }
  0xc0   :  { %1357 = vmatpush1.bf16.msra.mxu0 %v2122_v56  ;;  %1521 = vmatpush1.bf16.msra.mxu1 %v2125_v57  ;;  %v1605_v56 = vrot.slane %v1588_v31, %v262_v25 }
  0xc1   :  { %1358 = vmatprep.subr.bf16.mxu0 %v2130_v58  ;;  %1522 = vmatprep.subr.bf16.mxu1 %v2133_v59 }
  0xc4   :  { %1359 = vmatpush1.bf16.msra.mxu0 %v2128_v60  ;;  %1523 = vmatpush1.bf16.msra.mxu1 %v2131_v61 }
  0xc5   :  { %1360 = vmatprep.subr.bf16.mxu0 %v2136_v62  ;;  %1524 = vmatprep.subr.bf16.mxu1 %v2139_v63  ;;  %v1620_v62 = vstv %s2269_s4 }
  0xc8   :  { %1361 = vmatpush1.bf16.msra.mxu0 %v2134_v0  ;;  %1525 = vmatpush1.bf16.msra.mxu1 %v2137_v1 }
  0xc9   :  { %1362 = vmatprep.subr.bf16.mxu0 %v2142_v2  ;;  %1526 = vmatprep.subr.bf16.mxu1 %v2145_v3 }
  0xcc   :  { %1363 = vmatpush1.bf16.msra.mxu0 %v2140_v4  ;;  %1527 = vmatpush1.bf16.msra.mxu1 %v2143_v5 }
  0xcd   :  { %1364 = vmatprep.subr.bf16.mxu0 %v2148_v6  ;;  %1528 = vmatprep.subr.bf16.mxu1 %v2151_v7 }
  0xd0   :  { %1365 = vmatpush1.bf16.msra.mxu0 %v2146_v8  ;;  %1529 = vmatpush1.bf16.msra.mxu1 %v2149_v9 }
  0xd1   :  { %1375 = vmatprep.subr.bf16.mxu0 %v2154_v11  ;;  %1539 = vmatprep.subr.bf16.mxu1 %v2157_v12 }
  0xd3   :  { %1367 = vmatmul.mubr.bf16.vlgmr.msra.gmra.mrb[0].mxu0 %v47_v13  ;;  %1531 = vmatmul.mubr.bf16.vlgmr.msra.gmra.mrb[0].mxu1 %v47_v13 }
  0xd4   :  { %1376 = vmatpush1.bf16.msra.mxu0 %v2152_v14  ;;  %1540 = vmatpush1.bf16.msra.mxu1 %v2155_v15 }
  0xd5   :  { %1407 = vmatprep.mubr.bf16.mxu0 %v2189_v16  ;;  %1571 = vmatprep.mubr.bf16.mxu1 %v2189_v16 }
  0xdf   :  { %1830 = vmatmul.mubr.msk.bf16.vlgmr.msra.gmra.mrb[0].mxu0 %vm1248_vm0, %v49_v18  ;;  %1831 = vmatmul.mubr.msk.bf16.vlgmr.msra.gmra.mrb[0].mxu1 %vm1248_vm0, %v49_v18 }
 0x1b2   :  { %v1409_v30 = vpop.f32.mrb[0].mxu0  ;;  %v1573_v32 = vpop.f32.mrb[0].mxu1 }
 0x1b3   :  { %v1832_v33 = vadd.f32 %v1409_v30, %v251_v26  ;;  %v1834_v34 = vadd.f32 %v1573_v32, %v259_v27  ;;  %v1411_v35 = vpop.f32.mrb[1].mxu0  ;;  %v1575_v36 = vpop.f32.mrb[1].mxu1 }
 0x1b4   :  { %v1833_v37 = vadd.f32 %v1411_v35, %v255_v28  ;;  %v1835_v38 = vadd.f32 %v1575_v36, %v263_v29  ;;  %v1413_v39 = vpop.f32.mrb[2].mxu0  ;;  %v1577_v40 = vpop.f32.mrb[2].mxu1 }
 0x1b5   :  { %v1580_v41 = vmul.f32 0.1, %v1832_v33  ;;  %v1582_v43 = vmul.f32 0.1, %v1834_v34  ;;  %v1414_v44 = vpop.f32.mrb[3].mxu0  ;;  %v1578_v45 = vpop.f32.mrb[3].mxu1 }
 0x1b6   :  { %v1581_v46 = vmul.f32 0.1, %v1833_v37  ;;  %v1583_v48 = vmul.f32 0.1, %v1835_v38 }
 0x1b7   :  { %v1584_v49 = vmax.f32 %v1832_v33, %v1580_v41  ;;  %v1586_v50 = vmax.f32 %v1834_v34, %v1582_v43 }
 0x1b8   :  { %v1585_v51 = vmax.f32 %v1833_v37, %v1581_v46  ;;  %v1587_v55 = vmax.f32 %v1835_v38, %v1583_v48 }
 0x1b9   :  { %v1610_v53 = vmul.f32 %v1593_v42, %v1584_v49  ;;  %v1612_v57 = vmul.f32 %v1601_v52, %v1586_v50 }
 0x1ba   :  { %v1611_v54 = vmul.f32 %v1597_v47, %v1585_v51  ;;  %v1613_v59 = vmul.f32 %v1605_v56, %v1587_v55 }
 0x1bc   :  { %v1614_v58 = vadd.f32 %v1611_v54, %v1610_v53 }
 0x1be   :  { %v1615_v60 = vadd.f32 %v1614_v58, %v1612_v57 }
 0x1c0   :  { %v1616_v61 = vadd.f32 %v1615_v60, %v1613_v59 }
 0x1c2   :  { %1617 = vadd.xlane.f32.xlu0 %v1616_v61 }
 0x24f   :  { %v1618_v63 = vpop.xlane.xlu0 %1617 }
 0x250   :  { %v1621_v0 = vadd.f32 %v1620_v62, %v1618_v63 }
 0x252   :  { %v1622_v1 = vsub.f32 0.0, %v1621_v0 }
 0x254   :  { %v1623_v2 = vmul.f32 1.442695, %v1622_v1 }
 0x256   :  { %2158 = vpow2.f32 %v1623_v2 }
 0x260   :  { %v2159_v3 = vpop.eup %2158 }
 0x261   :  { %v1625_v4 = vadd.f32 1.0, %v2159_v3 }
 0x263   :  { %2160 = vrcp.f32 %v1625_v4 }
 0x26d   :  { %v2161_v5 = vpop.eup %2160 }
 0x26e   :  { %1628 = vst.msk [vmem:[%s2270_s5] sm:$0xff] %vm1627_vm1, %v2161_v5 }
 0x26f   :  { %1633 = vsyncpa [#allocation4], 1 }

</bundles_post_ra>
